<compile_context>
chip_gen: v6e
topology: v6e:2x2x1
jax: 0.10.0
libtpu: 0.0.40
codegen_flags: <defaults>
</compile_context>

<pallas_src>
import functools

import jax
import jax.numpy as jnp
from jax import lax
from jax.experimental import pallas as pl
from jax.experimental.pallas import tpu as pltpu

_LANE_TILE = 128      # default batch rows handled per grid step


def _gather_dot_kernel(uidx_ref, iidx_ref,        # SMEM (b_pad,) int32 (prefetched)
                       u_tab_ref, i_tab_ref,      # VMEM-resident embedding tables
                       out_ref,                   # VMEM (tb, 1) f32
                       u_buf, i_buf,              # VMEM (tb, H) scratch (table dtype)
                       *, n_total):
    tb = u_buf.shape[0]
    base = pl.program_id(0) * tb
    n_rows = jnp.minimum(tb, n_total - base)      # valid rows in this tile

    # Ragged last tile: zero the scratch so stale VMEM never feeds the reduce.
    # (Padded-row results are discarded in the wrapper; this only keeps them
    # deterministic.)
    @pl.when(n_rows < tb)
    def _():
        u_buf[...] = jnp.zeros_like(u_buf)
        i_buf[...] = jnp.zeros_like(i_buf)

    def gather_body(r, carry):
        u_row = uidx_ref[base + r]                # SMEM scalar reads
        i_row = iidx_ref[base + r]
        u_buf[pl.ds(r, 1), :] = u_tab_ref[pl.ds(u_row, 1), :]   # VMEM row gather
        i_buf[pl.ds(r, 1), :] = i_tab_ref[pl.ds(i_row, 1), :]
        return carry

    lax.fori_loop(0, n_rows, gather_body, 0)

    # Hot path: elementwise product (VPU) + per-row lane reduction (XLU).
    prod = u_buf[...].astype(jnp.float32) * i_buf[...].astype(jnp.float32)
    out_ref[...] = jnp.sum(prod, axis=-1, keepdims=True)


def _pick_batch_tile(batch):
    """128-row tiles for big batches; smaller tiles (>=8) for small batches so
    the grid has >=2 steps and v7x megacore can split the work."""
    if batch >= 2 * _LANE_TILE:
        return _LANE_TILE
    half = pl.cdiv(batch, 2)
    return max(8, ((half + 7) // 8) * 8)


def _test_forward_impl(user_idx, item_idx, user_emb, item_emb):
    """prediction[b] = dot(user_emb[user_idx[b]], item_emb[item_idx[b]])."""
    B = user_idx.shape[0]
    U, H = user_emb.shape
    I, H2 = item_emb.shape
    assert H == H2

    tb = _pick_batch_tile(B)
    b_pad = pl.cdiv(B, tb) * tb

    # torch nn.Embedding raises on OOB; here we clamp so a stray index cannot
    # read out of bounds, then pad the batch up to the tile with row 0.
    uidx = jnp.clip(user_idx.astype(jnp.int32), 0, U - 1)
    iidx = jnp.clip(item_idx.astype(jnp.int32), 0, I - 1)
    uidx = jnp.pad(uidx, (0, b_pad - B))
    iidx = jnp.pad(iidx, (0, b_pad - B))

    tab_bytes = (user_emb.size * user_emb.dtype.itemsize
                 + item_emb.size * item_emb.dtype.itemsize)
    scratch_bytes = tb * H * (user_emb.dtype.itemsize + item_emb.dtype.itemsize)
    # TODO(synk): tables whose combined size exceeds the per-generation VMEM
    # budget (~32-40 MiB; v7x has only 64 MiB physical) need a manual per-row
    # HBM DMA-gather path instead of VMEM residency.
    vmem_limit = int(min(48 << 20, max(16 << 20, 2 * (tab_bytes + scratch_bytes))))

    kernel = functools.partial(_gather_dot_kernel, n_total=B)

    out = pl.pallas_call(
        kernel,
        out_shape=jax.ShapeDtypeStruct((b_pad, 1), jnp.float32),
        grid_spec=pltpu.PrefetchScalarGridSpec(
            num_scalar_prefetch=2,
            grid=(b_pad // tb,),
            in_specs=[
                # Full tables resident in VMEM across the whole grid
                # (constant block index => single buffer, no re-DMA).
                pl.BlockSpec((U, H), lambda t, u_r, i_r: (0, 0)),
                pl.BlockSpec((I, H), lambda t, u_r, i_r: (0, 0)),
            ],
            out_specs=pl.BlockSpec((tb, 1), lambda t, u_r, i_r: (t, 0)),
            scratch_shapes=[
                pltpu.VMEM((tb, H), user_emb.dtype),
                pltpu.VMEM((tb, H), item_emb.dtype),
            ]),
        compiler_params=pltpu.CompilerParams(
            dimension_semantics=("parallel",),
            vmem_limit_bytes=vmem_limit),
    )(uidx, iidx, user_emb, item_emb)

    return out[:B, 0]


test_forward = jax.jit(_test_forward_impl)


def _xavier_normal(key, num_embeddings, hide_dim):
    # torch xavier_normal_ on (num_embeddings, hide_dim):
    # fan_in = hide_dim, fan_out = num_embeddings, gain = 1
    std = (2.0 / (num_embeddings + hide_dim)) ** 0.5
    return std * jax.random.normal(key, (num_embeddings, hide_dim), jnp.float32)


if __name__ == "__main__":
    userNum, itemNum, hide_dim = 64, 80, 32
    B = 8

    key = jax.random.PRNGKey(0)
    k_u, k_i, k_ui, k_ii = jax.random.split(key, 4)

    user_emb = _xavier_normal(k_u, userNum, hide_dim)
    item_emb = _xavier_normal(k_i, itemNum, hide_dim)
    user_idx = jax.random.randint(k_ui, (B,), 0, userNum, dtype=jnp.int32)
    item_idx = jax.random.randint(k_ii, (B,), 0, itemNum, dtype=jnp.int32)

    pred = test_forward(user_idx, item_idx, user_emb, item_emb)
    pred = jax.block_until_ready(pred)

    # Pure-JAX reference check (same semantics as the torch forward).
    ref = jnp.sum(user_emb[user_idx] * item_emb[item_idx], axis=1)
    assert pred.shape == (B,)
    assert jnp.allclose(pred, ref, atol=1e-5, rtol=1e-5)

    print("KERNEL_OK")
</pallas_src>

<mosaic_0001>
module attributes {stable_mosaic.version = 11 : i64} {
  func.func @_gather_dot_kernel(%arg0: i32, %arg1: memref<8xi32, #tpu.memory_space<smem>>, %arg2: memref<8xi32, #tpu.memory_space<smem>>, %arg3: memref<64x32xf32, #tpu.memory_space<vmem>>, %arg4: memref<80x32xf32, #tpu.memory_space<vmem>>, %arg5: memref<8x1xf32, #tpu.memory_space<vmem>>, %arg6: memref<8x32xf32, #tpu.memory_space<vmem>>, %arg7: memref<8x32xf32, #tpu.memory_space<vmem>>) attributes {dimension_semantics = [#tpu.dimension_semantics<parallel>], iteration_bounds = array<i64: 1>, scalar_prefetch = 2 : i64, scratch_operands = 2 : i64, tpu.core_type = #tpu.core_type<tc>, window_params = [{pipeline_mode = #tpu.pipeline_mode<synchronous>, transform_indices = @transform_0, window_bounds = array<i64: 64, 32>}, {pipeline_mode = #tpu.pipeline_mode<synchronous>, transform_indices = @transform_1, window_bounds = array<i64: 80, 32>}, {transform_indices = @transform_2, window_bounds = array<i64: 8, 1>}]} {
    %c8_i32 = arith.constant 8 : i32
    %0 = arith.muli %arg0, %c8_i32 : i32
    %c8_i32_0 = arith.constant 8 : i32
    %1 = arith.subi %c8_i32_0, %0 : i32
    %c8_i32_1 = arith.constant 8 : i32
    %2 = arith.minsi %c8_i32_1, %1 : i32
    %c8_i32_2 = arith.constant 8 : i32
    %3 = arith.cmpi slt, %2, %c8_i32_2 : i32
    %4 = arith.extui %3 : i1 to i32
    %c0_i32 = arith.constant 0 : i32
    %5 = arith.cmpi ne, %4, %c0_i32 : i32
    scf.if %5 {
      %cst_10 = arith.constant 0.000000e+00 : f32
      %14 = vector.broadcast %cst_10 : f32 to vector<8x32xf32>
      %c0_11 = arith.constant 0 : index
      %c0_12 = arith.constant 0 : index
      %15 = vector.load %arg6[%c0_11, %c0_12] : memref<8x32xf32, #tpu.memory_space<vmem>>, vector<8x32xf32>
      tpu.vector_store %arg6[%c0_11, %c0_12], %14 {strides = array<i32>} : memref<8x32xf32, #tpu.memory_space<vmem>>, vector<8x32xf32>,
      %cst_13 = arith.constant 0.000000e+00 : f32
      %16 = vector.broadcast %cst_13 : f32 to vector<8x32xf32>
      %c0_14 = arith.constant 0 : index
      %c0_15 = arith.constant 0 : index
      %17 = vector.load %arg7[%c0_14, %c0_15] : memref<8x32xf32, #tpu.memory_space<vmem>>, vector<8x32xf32>
      tpu.vector_store %arg7[%c0_14, %c0_15], %16 {strides = array<i32>} : memref<8x32xf32, #tpu.memory_space<vmem>>, vector<8x32xf32>,
    } else {
    }
    %c0_i32_3 = arith.constant 0 : i32
    %c0_i32_4 = arith.constant 0 : i32
    %6 = arith.subi %2, %c0_i32_4 : i32
    %7 = arith.addi %c0_i32_4, %6 : i32
    %c1_i32 = arith.constant 1 : i32
    scf.for %arg8 = %c0_i32_4 to %7 step %c1_i32  : i32 {
      %14 = arith.addi %0, %arg8 : i32
      %15 = arith.index_cast %14 : i32 to index
      %16 = memref.load %arg1[%15] : memref<8xi32, #tpu.memory_space<smem>>
      %17 = arith.addi %0, %arg8 : i32
      %18 = arith.index_cast %17 : i32 to index
      %19 = memref.load %arg2[%18] : memref<8xi32, #tpu.memory_space<smem>>
      %20 = arith.index_cast %16 : i32 to index
      %c0_10 = arith.constant 0 : index
      %21 = vector.load %arg3[%20, %c0_10] : memref<64x32xf32, #tpu.memory_space<vmem>>, vector<1x32xf32>
      %22 = arith.index_cast %arg8 : i32 to index
      %c0_11 = arith.constant 0 : index
      %23 = vector.load %arg6[%22, %c0_11] : memref<8x32xf32, #tpu.memory_space<vmem>>, vector<1x32xf32>
      tpu.vector_store %arg6[%22, %c0_11], %21 {strides = array<i32>} : memref<8x32xf32, #tpu.memory_space<vmem>>, vector<1x32xf32>,
      %24 = arith.index_cast %19 : i32 to index
      %c0_12 = arith.constant 0 : index
      %25 = vector.load %arg4[%24, %c0_12] : memref<80x32xf32, #tpu.memory_space<vmem>>, vector<1x32xf32>
      %26 = arith.index_cast %arg8 : i32 to index
      %c0_13 = arith.constant 0 : index
      %27 = vector.load %arg7[%26, %c0_13] : memref<8x32xf32, #tpu.memory_space<vmem>>, vector<1x32xf32>
      tpu.vector_store %arg7[%26, %c0_13], %25 {strides = array<i32>} : memref<8x32xf32, #tpu.memory_space<vmem>>, vector<1x32xf32>,
    }
    %c0 = arith.constant 0 : index
    %c0_5 = arith.constant 0 : index
    %8 = vector.load %arg6[%c0, %c0_5] : memref<8x32xf32, #tpu.memory_space<vmem>>, vector<8x32xf32>
    %c0_6 = arith.constant 0 : index
    %c0_7 = arith.constant 0 : index
    %9 = vector.load %arg7[%c0_6, %c0_7] : memref<8x32xf32, #tpu.memory_space<vmem>>, vector<8x32xf32>
    %10 = arith.mulf %8, %9 : vector<8x32xf32>
    %cst = arith.constant dense<0.000000e+00> : vector<8xf32>
    %11 = vector.multi_reduction <add>, %10, %cst [1] : vector<8x32xf32> to vector<8xf32>
    %12 = vector.shape_cast %11 : vector<8xf32> to vector<8x1xf32>
    %c0_8 = arith.constant 0 : index
    %c0_9 = arith.constant 0 : index
    %13 = vector.load %arg5[%c0_8, %c0_9] : memref<8x1xf32, #tpu.memory_space<vmem>>, vector<8x1xf32>
    tpu.vector_store %arg5[%c0_8, %c0_9], %12 {strides = array<i32>} : memref<8x1xf32, #tpu.memory_space<vmem>>, vector<8x1xf32>,
    return
  }
  func.func @transform_0(%arg0: i32, %arg1: memref<8xi32, #tpu.memory_space<smem>>, %arg2: memref<8xi32, #tpu.memory_space<smem>>) -> (i32, i32) {
    %c0_i32 = arith.constant 0 : i32
    %c0_i32_0 = arith.constant 0 : i32
    %c0_i32_1 = arith.constant 0 : i32
    return %c0_i32, %c0_i32_0 : i32, i32
  }
  func.func @transform_1(%arg0: i32, %arg1: memref<8xi32, #tpu.memory_space<smem>>, %arg2: memref<8xi32, #tpu.memory_space<smem>>) -> (i32, i32) {
    %c0_i32 = arith.constant 0 : i32
    %c0_i32_0 = arith.constant 0 : i32
    %c0_i32_1 = arith.constant 0 : i32
    return %c0_i32, %c0_i32_0 : i32, i32
  }
  func.func @transform_2(%arg0: i32, %arg1: memref<8xi32, #tpu.memory_space<smem>>, %arg2: memref<8xi32, #tpu.memory_space<smem>>) -> (i32, i32) {
    %c0_i32 = arith.constant 0 : i32
    %c0_i32_0 = arith.constant 0 : i32
    return %arg0, %c0_i32 : i32, i32
  }
}

</mosaic_0001>

<bundles_post_ra>
// kernel: _test_forward_impl.1
= control target key start
LH: loop header
LB: loop body
LE: loop exit
PB: predicated region body
PF: predicated region fallthrough
CT: control target
= control target key end

     0   :  { %s160_s0 = inlined_call_operand.vmem [shape: s32[8], index: 0, kind: input, shape index: {}]   ;;  %s161_s2 = inlined_call_operand.vmem [shape: f32[64,32], index: 2, kind: input, shape index: {}]   ;;  %s162_s3 = inlined_call_operand.vmem [shape: f32[80,32], index: 3, kind: input, shape index: {}]   ;;  %s163_s4 = inlined_call_operand.vmem [shape: f32[8,1], index: 4, kind: output, shape index: {}]   ;;  %s164_s1 = inlined_call_operand.vmem [shape: s32[8], index: 1, kind: input, shape index: {}]  }
   0x1   :  { %s9_s17 = sshll.u32 %s160_s0, 4  ;;  %s13_s20 = sshll.u32 %s164_s1, 4  ;;  %s10_s17 = int_to_ptr.vmem [resolvable:$true] %s9_s17  ;;  %s14_s20 = int_to_ptr.vmem [resolvable:$true] %s13_s20 }
   0x2   :  { %s84_s21 = scalar_lea.vmem %s10_s17, 16  ;;  %p89_p1 = scmp.lt.s32.totalorder %s10_s17, %s10_s17 }
   0x3   :  { %p85_p0 = scmp.ne.s32.totalorder %s10_s17, %s84_s21  ;;  %p90_p2 = scmp.lt.s32.totalorder %s84_s21, %s84_s21 }
   0x5   :  { %p91_p3 = por %p90_p2, %p89_p1 }
   0x7   :  { %p92_p4 = pnand %p91_p3, %p85_p0 }
   0x9   :  { %95 = shalt.err (!%p92_p4)  }
   0xa   :  { %s118_s22 = smov [#allocation5]   ;;  %s96_s23 = scalar_lea.vmem %s14_s20, 16 }
   0xb   :  { %12 = dma.vmem_to_smem %s10_s17, 16, %s118_s22, [#allocation4] }
   0xc   :  { %p97_p5 = scmp.ne.s32.totalorder %s14_s20, %s96_s23  ;;  %p101_p6 = scmp.lt.s32.totalorder %s14_s20, %s14_s20 }
   0xd   :  { %p102_p7 = scmp.lt.s32.totalorder %s96_s23, %s96_s23 }
   0xf   :  { %p103_p8 = por %p102_p7, %p101_p6 }
  0x11   :  { %p104_p9 = pnand %p103_p8, %p97_p5 }
  0x13   :  { %107 = shalt.err (!%p104_p9)  }
  0x14   :  { %s119_s0 = smov [#allocation6]  }
  0x15   :  { %16 = dma.vmem_to_smem %s14_s20, 16, %s119_s0, [#allocation4] }
  0x16   :  { %112 = dma.done.wait [#allocation4], 32 }
  0x17   :  { %113 = vsyncadd [#allocation4], 4294967264 }
  0x18   :  { %18 = sfence }
  0x19   :  { %s114_s1 = smov 0  }
  0x1a LB: > { %s41_s24 = sld [smem:[#allocation5 + %s116_s1]]  ;;  %vm46_vm0 = vcmask 253952   ;;  %s45_s6 = scalar_lea.vmem [#allocation2], %s116_s1  ;;  %s116_s1 = sphi %s114_s1, %s37_s1  }
  0x1b   : > { %s42_s25 = sld [smem:[#allocation6 + %s116_s1]]  ;;  %s50_s7 = scalar_lea.vmem [#allocation3], %s116_s1 }
  0x1c   : > { %s37_s1 = sadd.s32 1, %s116_s1  }
  0x1d   : > { %p36_p10 = scmp.ge.s32.totalorder %s37_s1, 8 }
  0x1e   :  { %vm55_vm1 = vcmask (%p36_p10), 261120   ;;  %vm59_vm2 = vcmask (%p36_p10), 7168  }
  0x1f   :  { %39 = sbr.rel (!%p36_p10) target bundleno = 26 (0x1a), region = 43 }
  0x20   : > { %s43_s28 = scalar_lea.vmem %s161_s2, %s41_s24 }
  0x21   : > { %v44_v0 = vld [vmem:[%s43_s28] sm:$0x1]  ;;  %s48_s5 = scalar_lea.vmem %s162_s3, %s42_s25 }
  0x22   : > { %47 = vst.msk [vmem:[%s45_s6] sm:$0x1] %vm46_vm0, %v44_v0  ;;  %v49_v1 = vld [vmem:[%s48_s5] sm:$0x1] }
  0x23   : > { %51 = vst.msk [vmem:[%s50_s7] sm:$0x1] %vm46_vm0, %v49_v1 }
  0x29   :  { %v52_v2 = vld [vmem:[#allocation2] sm:$0xff] }
  0x2a   :  { %v53_v3 = vld [vmem:[#allocation3] sm:$0xff] }
  0x2b   :  { %v54_v4 = vmul.f32 %v53_v3, %v52_v2 }
  0x2d   :  { %v56_v5 = vsel %vm55_vm1, %v54_v4, 0.0 }
  0x2e   :  { %57 = vadd.xlane.f32.xlu0 %v56_v5 }
  0xb7   :  { %v58_v6 = vpop.xlane.xlu0 %57 }
  0xb8   :  { %60 = vst.msk [vmem:[%s163_s4] sm:$0xff] %vm59_vm2, %v58_v6 }

</bundles_post_ra>
